<compile_context>
chip_gen: v7x
topology: tpu7x:2x2x1
jax: 0.10.0
libtpu: 0.0.40
codegen_flags: <defaults>
</compile_context>

<pallas_src>
import numpy as np
import jax
import jax.numpy as jnp
from jax import lax
from jax.experimental import pallas as pl
from jax.experimental.pallas import tpu as pltpu


def _adaptive_pool_kernel(x_ref, w0_ref, w2t_ref, pbmat_ref, w3t_ref, consts_ref,
                          out_ref):
    """One grid step == one block of `Bblk` batch elements (everything in VMEM).

    x_ref     : (Bblk, N, D)   node set block (K-mean + transpose done in wrapper)
    w0_ref    : (D, D)         attention weight W_0
    w2t_ref   : (H, HM)        input2centroids_ Linear weight, transposed (in, out)
    pbmat_ref : (2*HM, HM)     rows [0:HM]  = per-head sum selector P
                               rows [HM:]   = 1x1-conv-over-heads fold (cols >= M are 0)
    w3t_ref   : (D, Dpad)      dim_feat_transformation weight^T, zero-padded to 128 lanes
    consts_ref: (8, Dpad)      packed small constants:
                                 row0 = W1 (Linear 1->H weight), row1 = B1,
                                 row2 = B2, row3 = conv bias (lanes 0..M-1),
                                 row4 = B3 (zero-padded to Dpad)
    out_ref   : (Bblk, M, Dpad)
    """
    x = x_ref[...]                                        # (Bb, N, D) f32
    Bb, N, D = x.shape
    H, HM = w2t_ref.shape
    M = out_ref.shape[1]
    Dpad = out_ref.shape[2]

    consts = consts_ref[...]                              # (8, Dpad)
    w1_row = consts[0:1, :H]                              # (1, H)
    b1_row = consts[1:2, :H]                              # (1, H)
    b2_row = consts[2:3, :HM]                             # (1, HM)
    convb_row = consts[3:4, :M]                           # (1, M)
    b3_row = consts[4:5, :]                               # (1, Dpad)

    pb = pbmat_ref[...]                                   # (2*HM, HM)
    p_sel = pb[:HM, :]                                    # (HM, HM)  head-sum selector
    cw_mat = pb[HM:, :]                                   # (HM, HM)  conv fold (cols>=M zero)

    # ---- get_att: attention-weighted summary g of the node set ----
    temp = jnp.mean(x, axis=1)                            # (Bb, D)
    h_avg = jnp.tanh(jnp.dot(temp, w0_ref[...],
                             preferred_element_type=jnp.float32))          # (Bb, D)
    # att as VPU multiply + lane reduce (no 1-wide MXU output)
    att = jnp.sum(x * h_avg[:, None, :], axis=2, keepdims=True)            # (Bb, N, 1)
    # g kept as a matmul so it lands directly in (Bb, D, 1) orientation
    g = jnp.einsum('bnd,bno->bdo', x, att,
                   preferred_element_type=jnp.float32)                     # (Bb, D, 1)

    # ---- centroid generation: Linear(1->H)+ReLU (VPU broadcast), Linear(H->HM)+ReLU ----
    lin1 = jnp.maximum(g * w1_row + b1_row, 0.0)          # (Bb, D, H)
    lin1_f = lin1.reshape(Bb * D, H)                      # batch folded into rows
    lin2_f = jnp.maximum(
        jnp.dot(lin1_f, w2t_ref[...], preferred_element_type=jnp.float32) + b2_row,
        0.0)                                              # (Bb*D, HM)
    cent = lin2_f.reshape(Bb, D, HM)                      # centroid k = h*M + m -> column k

    # ---- cosine similarity nodes vs centroids ----
    dots = jnp.einsum('bnd,bdk->bnk', x, cent,
                      preferred_element_type=jnp.float32)                  # (Bb, N, HM)
    x_sq = jnp.sum(x * x, axis=2, keepdims=True)          # (Bb, N, 1)
    c_sq = jnp.sum(cent * cent, axis=1, keepdims=True)    # (Bb, 1, HM)
    # == dots / max(||x|| * ||c||, 1e-6), via one EUP rsqrt instead of 2 sqrt + 1 div
    cos = dots * lax.rsqrt(jnp.maximum(x_sq * c_sq, 1e-12))

    # ---- per-head normalisation over the M centroids + 1x1 conv over heads ----
    cos_f = cos.reshape(Bb * N, HM)
    head_sum = jnp.dot(cos_f, p_sel, preferred_element_type=jnp.float32)   # (Bb*N, HM)
    cn = cos_f / (head_sum + 1e-10)
    c_all = jnp.dot(cn, cw_mat, preferred_element_type=jnp.float32)        # (Bb*N, HM)
    c = (c_all[:, :M] + convb_row).reshape(Bb, N, M)                       # (Bb, N, M)

    # ---- new_node_set = C @ node_set, then output Linear (lane-dense padded) ----
    new = jnp.einsum('bnm,bnd->bmd', c, x,
                     preferred_element_type=jnp.float32)                   # (Bb, M, D)
    out_f = jnp.dot(new.reshape(Bb * M, D), w3t_ref[...],
                    preferred_element_type=jnp.float32) + b3_row           # (Bb*M, Dpad)
    out_ref[...] = out_f.reshape(Bb, M, Dpad).astype(out_ref.dtype)


def adaptive_pooling_forward(x4d, params, *, heads, n_output, dim_output,
                             batch_block=None, vmem_budget_bytes=None):
    """x4d: [B, Dim_input, N_input, K] float32. Returns [B, N_output, Dim_output]."""
    W0, W1, B1, W2, B2, CW, CB, W3, B3 = params
    B, D, N, K = x4d.shape
    H, M, Dout = heads, n_output, dim_output
    HM = H * M
    f32 = jnp.float32

    # Layout plumbing hoisted out of the kernel: node_set = mean over K, [B, N, D].
    ns = jnp.mean(jnp.swapaxes(x4d, 1, 2).astype(f32), axis=3)              # (B, N, D)

    # Lane-dense output width (unmasked stores); sliced back to Dout outside.
    def rup(v, m):
        return -(-int(v) // m) * m
    Dpad = max(128, rup(Dout, 128))

    # ---- batch blocking: default to a single grid step (grid is a serial loop on
    # single-TC v5e/v6e), capped by a VMEM budget so the working set also fits v7x's
    # smaller VMEM (64 MiB physical / 32 MiB scoped default) with headroom.
    per_row_bytes = 4 * (
        2 * rup(N, 8) * rup(D, 128)          # x block (double-buffered)
        + rup(D, 8) * rup(HM, 128)           # centroids
        + 4 * rup(N, 8) * rup(HM, 128)       # dots / cos / head_sum / cn
        + rup(N, 8) * rup(M, 128)            # assignment matrix C
        + rup(M, 8) * rup(D, 128)            # pooled node set
        + 2 * rup(M, 8) * Dpad)              # output block (double-buffered)
    if vmem_budget_bytes is None:
        vmem_budget_bytes = 16 * 1024 * 1024
    if batch_block is None:
        batch_block = max(1, vmem_budget_bytes // per_row_bytes)
        # TODO(synk): on 2-TensorCore parts (v7x) prefer two core-parallel batch blocks
        # when B is large; single-TC v5e/v6e want exactly one grid step.
    Bblk = int(max(1, min(batch_block, B)))
    nblk = pl.cdiv(B, Bblk)
    Bpad_batch = nblk * Bblk
    if Bpad_batch != B:
        ns = jnp.pad(ns, ((0, Bpad_batch - B), (0, 0), (0, 0)))

    # ---- constant massaging, done once outside the kernel ----
    w0 = W0.astype(f32)                                   # (D, D)
    w2t = W2.astype(f32).T                                # (H, HM)

    k_idx = jnp.arange(HM)
    # Per-head sum selector: P[k, j] = 1 iff k and j belong to the same head.
    p_sel = (k_idx[:, None] // M == k_idx[None, :] // M).astype(f32)        # (HM, HM)
    # 1x1 conv over heads folded into a matrix; padded to HM columns (cols >= M zero).
    cw_mat = jnp.where((k_idx[:, None] % M) == jnp.arange(HM)[None, :],
                       CW.astype(f32)[k_idx // M][:, None], 0.0)            # (HM, HM)
    pbmat = jnp.concatenate([p_sel, cw_mat], axis=0)                        # (2*HM, HM)

    # Output weight padded to a lane-dense width.
    w3t = jnp.zeros((D, Dpad), f32).at[:, :Dout].set(W3.astype(f32).T)      # (D, Dpad)

    # All the tiny vector constants packed into one (8, Dpad) tile (one DMA, one buffer).
    consts = jnp.zeros((8, Dpad), f32)
    consts = consts.at[0, :H].set(W1.astype(f32).reshape(H))   # Linear(1->H) weight
    consts = consts.at[1, :H].set(B1.astype(f32))              # Linear(1->H) bias
    consts = consts.at[2, :HM].set(B2.astype(f32))             # Linear(H->HM) bias
    consts = consts.at[3, :M].set(CB.astype(f32)[0])           # conv bias
    consts = consts.at[4, :Dout].set(B3.astype(f32))           # output Linear bias

    out = pl.pallas_call(
        _adaptive_pool_kernel,
        out_shape=jax.ShapeDtypeStruct((Bpad_batch, M, Dpad), f32),
        grid_spec=pltpu.PrefetchScalarGridSpec(
            num_scalar_prefetch=0,
            grid=(nblk,),
            in_specs=[
                pl.BlockSpec((Bblk, N, D), lambda g: (g, 0, 0)),   # node_set block
                pl.BlockSpec((D, D), lambda g: (0, 0)),            # W_0
                pl.BlockSpec((H, HM), lambda g: (0, 0)),           # W2^T
                pl.BlockSpec((2 * HM, HM), lambda g: (0, 0)),      # [P ; conv fold]
                pl.BlockSpec((D, Dpad), lambda g: (0, 0)),         # W3^T (lane-padded)
                pl.BlockSpec((8, Dpad), lambda g: (0, 0)),         # packed small constants
            ],
            out_specs=pl.BlockSpec((Bblk, M, Dpad), lambda g: (g, 0, 0)),
        ),
        compiler_params=pltpu.CompilerParams(
            dimension_semantics=("parallel",),       # batch blocks are independent
            vmem_limit_bytes=32 * 1024 * 1024),
    )(ns, w0, w2t, pbmat, w3t, consts)

    return out[:B, :, :Dout]


def reference_forward(x4d, params, *, heads, n_output, dim_output):
    """Pure-JAX transcription of the PyTorch forward (for validation)."""
    W0, W1, B1, W2, B2, CW, CB, W3, B3 = params
    H, M = heads, n_output
    ns = jnp.mean(jnp.swapaxes(x4d, 1, 2), axis=3)                  # [B, N, D]
    Bsz, N, D = ns.shape
    temp = jnp.mean(ns, axis=1, keepdims=True)                      # [B,1,D]
    h_avg = jnp.tanh(jnp.matmul(temp, W0))                          # [B,1,D]
    att = jnp.matmul(ns, jnp.swapaxes(h_avg, 1, 2))                 # [B,N,1]
    g = jnp.matmul(jnp.swapaxes(att, 1, 2), ns)                     # [B,1,D]
    bc = jnp.swapaxes(g, 1, 2)                                      # [B,D,1]
    lin1 = jax.nn.relu(jnp.matmul(bc, W1.T) + B1)                   # [B,D,H]
    lin2 = jax.nn.relu(jnp.matmul(lin1, W2.T) + B2)                 # [B,D,H*M]
    cent = jnp.swapaxes(lin2, 1, 2).reshape(Bsz, H, M, D)           # [B,H,M,D]
    dot = jnp.einsum('bnd,bhmd->bhmn', ns, cent)
    xn = jnp.sqrt(jnp.sum(ns * ns, axis=-1))                        # [B,N]
    cn = jnp.sqrt(jnp.sum(cent * cent, axis=-1))                    # [B,H,M]
    denom = jnp.maximum(cn[..., None] * xn[:, None, None, :], 1e-6)
    Ch = dot / denom
    Ch = Ch / (jnp.sum(Ch, axis=2, keepdims=True) + 1e-10)
    C = jnp.einsum('h,bhmn->bmn', CW, Ch) + CB[0]                   # [B,M,N]
    new = jnp.matmul(C, ns)                                         # [B,M,D]
    return jnp.matmul(new, W3.T) + B3


if __name__ == "__main__":
    # Module config (Heads, Dim_input, N_output, Dim_output) and input sizes.
    B, N_input, K = 2, 16, 8
    Heads, Dim_input, N_output, Dim_output = 4, 32, 8, 16
    D, H, M, Dout = Dim_input, Heads, N_output, Dim_output
    HM = H * M

    key = jax.random.PRNGKey(0)
    keys = jax.random.split(key, 10)
    # Input in the module's native layout [B, Dim_input, N_input, K].
    x4d = jax.random.normal(keys[0], (B, Dim_input, N_input, K), jnp.float32)

    # Deterministic synthetic parameters (shapes from __init__). The original __init__
    # zero-initializes input2centroids_{weight,bias}; small random values are used here
    # so the compute path is exercised non-degenerately.
    W0 = jax.random.normal(keys[1], (D, D), jnp.float32) * (2.0 / (D + D)) ** 0.5  # glorot
    W1 = jax.random.normal(keys[2], (H, 1), jnp.float32) * 0.1
    B1 = jax.random.normal(keys[3], (H,), jnp.float32) * 0.1
    W2 = jax.random.normal(keys[4], (HM, H), jnp.float32) * (1.0 / H ** 0.5)
    B2 = jax.random.normal(keys[5], (HM,), jnp.float32) * 0.1
    CW = jax.random.normal(keys[6], (H,), jnp.float32) * (1.0 / H ** 0.5)   # Conv2d(H,1,1x1) weight
    CB = jax.random.normal(keys[7], (1,), jnp.float32) * 0.1                # Conv2d bias
    W3 = jax.random.normal(keys[8], (Dout, D), jnp.float32) * (1.0 / D ** 0.5)
    B3 = jax.random.normal(keys[9], (Dout,), jnp.float32) * 0.1
    params = (W0, W1, B1, W2, B2, CW, CB, W3, B3)

    out = adaptive_pooling_forward(x4d, params, heads=H, n_output=M, dim_output=Dout)
    out = jax.block_until_ready(out)

    ref = reference_forward(x4d, params, heads=H, n_output=M, dim_output=Dout)
    assert out.shape == (B, M, Dout)
    # Exact (non-approx) math is used in-kernel; tolerance has headroom only for
    # accumulation-order differences amplified by the per-head normalisation.
    np.testing.assert_allclose(np.asarray(out), np.asarray(ref), rtol=1e-3, atol=1e-3)
    print("KERNEL_OK")
</pallas_src>

<mosaic_0001>
module attributes {stable_mosaic.version = 11 : i64} {
  func.func @_adaptive_pool_kernel(%arg0: i32, %arg1: memref<2x16x32xf32, #tpu.memory_space<vmem>>, %arg2: memref<32x32xf32, #tpu.memory_space<vmem>>, %arg3: memref<4x32xf32, #tpu.memory_space<vmem>>, %arg4: memref<64x32xf32, #tpu.memory_space<vmem>>, %arg5: memref<32x128xf32, #tpu.memory_space<vmem>>, %arg6: memref<8x128xf32, #tpu.memory_space<vmem>>, %arg7: memref<2x8x128xf32, #tpu.memory_space<vmem>>) attributes {dimension_semantics = [#tpu.dimension_semantics<parallel>], iteration_bounds = array<i64: 1>, scalar_prefetch = 0 : i64, scratch_operands = 0 : i64, tpu.core_type = #tpu.core_type<tc>, window_params = [{transform_indices = @transform_0, window_bounds = array<i64: 2, 16, 32>}, {pipeline_mode = #tpu.pipeline_mode<synchronous>, transform_indices = @transform_1, window_bounds = array<i64: 32, 32>}, {pipeline_mode = #tpu.pipeline_mode<synchronous>, transform_indices = @transform_2, window_bounds = array<i64: 4, 32>}, {pipeline_mode = #tpu.pipeline_mode<synchronous>, transform_indices = @transform_3, window_bounds = array<i64: 64, 32>}, {pipeline_mode = #tpu.pipeline_mode<synchronous>, transform_indices = @transform_4, window_bounds = array<i64: 32, 128>}, {pipeline_mode = #tpu.pipeline_mode<synchronous>, transform_indices = @transform_5, window_bounds = array<i64: 8, 128>}, {transform_indices = @transform_6, window_bounds = array<i64: 2, 8, 128>}]} {
    %c0 = arith.constant 0 : index
    %c0_0 = arith.constant 0 : index
    %c0_1 = arith.constant 0 : index
    %0 = vector.load %arg1[%c0, %c0_0, %c0_1] : memref<2x16x32xf32, #tpu.memory_space<vmem>>, vector<2x16x32xf32>
    %c0_2 = arith.constant 0 : index
    %c0_3 = arith.constant 0 : index
    %1 = vector.load %arg6[%c0_2, %c0_3] : memref<8x128xf32, #tpu.memory_space<vmem>>, vector<8x128xf32>
    %2 = vector.extract_strided_slice %1 {offsets = [0, 0], sizes = [1, 4], strides = [1, 1]} : vector<8x128xf32> to vector<1x4xf32>
    %3 = vector.extract_strided_slice %1 {offsets = [1, 0], sizes = [1, 4], strides = [1, 1]} : vector<8x128xf32> to vector<1x4xf32>
    %4 = vector.extract_strided_slice %1 {offsets = [2, 0], sizes = [1, 32], strides = [1, 1]} : vector<8x128xf32> to vector<1x32xf32>
    %5 = vector.extract_strided_slice %1 {offsets = [3, 0], sizes = [1, 8], strides = [1, 1]} : vector<8x128xf32> to vector<1x8xf32>
    %6 = vector.extract_strided_slice %1 {offsets = [4, 0], sizes = [1, 128], strides = [1, 1]} : vector<8x128xf32> to vector<1x128xf32>
    %c0_4 = arith.constant 0 : index
    %c0_5 = arith.constant 0 : index
    %7 = vector.load %arg4[%c0_4, %c0_5] : memref<64x32xf32, #tpu.memory_space<vmem>>, vector<64x32xf32>
    %8 = vector.extract_strided_slice %7 {offsets = [0, 0], sizes = [32, 32], strides = [1, 1]} : vector<64x32xf32> to vector<32x32xf32>
    %9 = vector.extract_strided_slice %7 {offsets = [32, 0], sizes = [32, 32], strides = [1, 1]} : vector<64x32xf32> to vector<32x32xf32>
    %cst = arith.constant dense<0.000000e+00> : vector<2x32xf32>
    %10 = vector.multi_reduction <add>, %0, %cst [1] : vector<2x16x32xf32> to vector<2x32xf32>
    %cst_6 = arith.constant 1.600000e+01 : f32
    %11 = vector.broadcast %cst_6 : f32 to vector<2x32xf32>
    %12 = arith.divf %10, %11 : vector<2x32xf32>
    %c0_7 = arith.constant 0 : index
    %c0_8 = arith.constant 0 : index
    %13 = vector.load %arg2[%c0_7, %c0_8] : memref<32x32xf32, #tpu.memory_space<vmem>>, vector<32x32xf32>
    %cst_9 = arith.constant dense<0.000000e+00> : vector<2x32xf32>
    %14 = tpu.matmul %12, %13, %cst_9 {dimension_numbers = #tpu.dot_dimension_numbers<[1], [0], [0], [1], [0, 0, 1, 1], [], []>} : vector<2x32xf32>, vector<32x32xf32>, vector<2x32xf32> -> vector<2x32xf32>
    %15 = math.tanh %14 : vector<2x32xf32>
    %16 = vector.shape_cast %15 : vector<2x32xf32> to vector<2x1x32xf32>
    %17 = vector.broadcast %16 : vector<2x1x32xf32> to vector<2x16x32xf32>
    %18 = arith.mulf %0, %17 : vector<2x16x32xf32>
    %cst_10 = arith.constant dense<0.000000e+00> : vector<2x16xf32>
    %19 = vector.multi_reduction <add>, %18, %cst_10 [2] : vector<2x16x32xf32> to vector<2x16xf32>
    %20 = vector.shape_cast %19 : vector<2x16xf32> to vector<2x16x1xf32>
    "tpu.trace_start"() <{level = 10 : i32, message = "bnd,bno->bdo"}> : () -> ()
    %cst_11 = arith.constant dense<0.000000e+00> : vector<2x32x1xf32>
    %21 = tpu.matmul %0, %20, %cst_11 {dimension_numbers = #tpu.dot_dimension_numbers<[1], [1], [2], [2], [0, 0, 0, 2, 1, 2], [0], [0]>} : vector<2x16x32xf32>, vector<2x16x1xf32>, vector<2x32x1xf32> -> vector<2x32x1xf32>
    "tpu.trace_stop"() : () -> ()
    %22 = vector.shape_cast %2 : vector<1x4xf32> to vector<1x1x4xf32>
    %23 = vector.broadcast %21 : vector<2x32x1xf32> to vector<2x32x4xf32>
    %24 = vector.broadcast %22 : vector<1x1x4xf32> to vector<2x32x4xf32>
    %25 = arith.mulf %23, %24 : vector<2x32x4xf32>
    %26 = vector.shape_cast %3 : vector<1x4xf32> to vector<1x1x4xf32>
    %27 = vector.broadcast %26 : vector<1x1x4xf32> to vector<2x32x4xf32>
    %28 = arith.addf %25, %27 : vector<2x32x4xf32>
    %cst_12 = arith.constant 0.000000e+00 : f32
    %29 = vector.broadcast %cst_12 : f32 to vector<2x32x4xf32>
    %30 = arith.maximumf %28, %29 : vector<2x32x4xf32>
    %31 = vector.shape_cast %30 : vector<2x32x4xf32> to vector<64x4xf32>
    %c0_13 = arith.constant 0 : index
    %c0_14 = arith.constant 0 : index
    %32 = vector.load %arg3[%c0_13, %c0_14] : memref<4x32xf32, #tpu.memory_space<vmem>>, vector<4x32xf32>
    %cst_15 = arith.constant dense<0.000000e+00> : vector<64x32xf32>
    %33 = tpu.matmul %31, %32, %cst_15 {dimension_numbers = #tpu.dot_dimension_numbers<[1], [0], [0], [1], [0, 0, 1, 1], [], []>} : vector<64x4xf32>, vector<4x32xf32>, vector<64x32xf32> -> vector<64x32xf32>
    %34 = vector.broadcast %4 : vector<1x32xf32> to vector<64x32xf32>
    %35 = arith.addf %33, %34 : vector<64x32xf32>
    %cst_16 = arith.constant 0.000000e+00 : f32
    %36 = vector.broadcast %cst_16 : f32 to vector<64x32xf32>
    %37 = arith.maximumf %35, %36 : vector<64x32xf32>
    %38 = vector.shape_cast %37 : vector<64x32xf32> to vector<2x32x32xf32>
    "tpu.trace_start"() <{level = 10 : i32, message = "bnd,bdk->bnk"}> : () -> ()
    %cst_17 = arith.constant dense<0.000000e+00> : vector<2x16x32xf32>
    %39 = tpu.matmul %0, %38, %cst_17 {dimension_numbers = #tpu.dot_dimension_numbers<[2], [1], [1], [2], [0, 0, 0, 1, 1, 2], [0], [0]>} : vector<2x16x32xf32>, vector<2x32x32xf32>, vector<2x16x32xf32> -> vector<2x16x32xf32>
    "tpu.trace_stop"() : () -> ()
    %40 = arith.mulf %0, %0 : vector<2x16x32xf32>
    %cst_18 = arith.constant dense<0.000000e+00> : vector<2x16xf32>
    %41 = vector.multi_reduction <add>, %40, %cst_18 [2] : vector<2x16x32xf32> to vector<2x16xf32>
    %42 = vector.shape_cast %41 : vector<2x16xf32> to vector<2x16x1xf32>
    %43 = arith.mulf %38, %38 : vector<2x32x32xf32>
    %cst_19 = arith.constant dense<0.000000e+00> : vector<2x32xf32>
    %44 = vector.multi_reduction <add>, %43, %cst_19 [1] : vector<2x32x32xf32> to vector<2x32xf32>
    %45 = vector.shape_cast %44 : vector<2x32xf32> to vector<2x1x32xf32>
    %46 = vector.broadcast %42 : vector<2x16x1xf32> to vector<2x16x32xf32>
    %47 = vector.broadcast %45 : vector<2x1x32xf32> to vector<2x16x32xf32>
    %48 = arith.mulf %46, %47 : vector<2x16x32xf32>
    %cst_20 = arith.constant 9.99999996E-13 : f32
    %49 = vector.broadcast %cst_20 : f32 to vector<2x16x32xf32>
    %50 = arith.maximumf %48, %49 : vector<2x16x32xf32>
    %51 = math.rsqrt %50 : vector<2x16x32xf32>
    %52 = arith.mulf %39, %51 : vector<2x16x32xf32>
    %53 = vector.shape_cast %52 : vector<2x16x32xf32> to vector<32x32xf32>
    %cst_21 = arith.constant dense<0.000000e+00> : vector<32x32xf32>
    %54 = tpu.matmul %53, %8, %cst_21 {dimension_numbers = #tpu.dot_dimension_numbers<[1], [0], [0], [1], [0, 0, 1, 1], [], []>} : vector<32x32xf32>, vector<32x32xf32>, vector<32x32xf32> -> vector<32x32xf32>
    %cst_22 = arith.constant 1.000000e-10 : f32
    %55 = vector.broadcast %cst_22 : f32 to vector<32x32xf32>
    %56 = arith.addf %54, %55 : vector<32x32xf32>
    %57 = arith.divf %53, %56 : vector<32x32xf32>
    %cst_23 = arith.constant dense<0.000000e+00> : vector<32x32xf32>
    %58 = tpu.matmul %57, %9, %cst_23 {dimension_numbers = #tpu.dot_dimension_numbers<[1], [0], [0], [1], [0, 0, 1, 1], [], []>} : vector<32x32xf32>, vector<32x32xf32>, vector<32x32xf32> -> vector<32x32xf32>
    %59 = vector.extract_strided_slice %58 {offsets = [0, 0], sizes = [32, 8], strides = [1, 1]} : vector<32x32xf32> to vector<32x8xf32>
    %60 = vector.broadcast %5 : vector<1x8xf32> to vector<32x8xf32>
    %61 = arith.addf %59, %60 : vector<32x8xf32>
    %62 = vector.shape_cast %61 : vector<32x8xf32> to vector<2x16x8xf32>
    "tpu.trace_start"() <{level = 10 : i32, message = "bnm,bnd->bmd"}> : () -> ()
    %cst_24 = arith.constant dense<0.000000e+00> : vector<2x8x32xf32>
    %63 = tpu.matmul %62, %0, %cst_24 {dimension_numbers = #tpu.dot_dimension_numbers<[1], [1], [2], [2], [0, 0, 0, 2, 1, 2], [0], [0]>} : vector<2x16x8xf32>, vector<2x16x32xf32>, vector<2x8x32xf32> -> vector<2x8x32xf32>
    "tpu.trace_stop"() : () -> ()
    %64 = vector.shape_cast %63 : vector<2x8x32xf32> to vector<16x32xf32>
    %c0_25 = arith.constant 0 : index
    %c0_26 = arith.constant 0 : index
    %65 = vector.load %arg5[%c0_25, %c0_26] : memref<32x128xf32, #tpu.memory_space<vmem>>, vector<32x128xf32>
    %cst_27 = arith.constant dense<0.000000e+00> : vector<16x128xf32>
    %66 = tpu.matmul %64, %65, %cst_27 {dimension_numbers = #tpu.dot_dimension_numbers<[1], [0], [0], [1], [0, 0, 1, 1], [], []>} : vector<16x32xf32>, vector<32x128xf32>, vector<16x128xf32> -> vector<16x128xf32>
    %67 = vector.broadcast %6 : vector<1x128xf32> to vector<16x128xf32>
    %68 = arith.addf %66, %67 : vector<16x128xf32>
    %69 = vector.shape_cast %68 : vector<16x128xf32> to vector<2x8x128xf32>
    %c0_28 = arith.constant 0 : index
    %c0_29 = arith.constant 0 : index
    %c0_30 = arith.constant 0 : index
    %70 = vector.load %arg7[%c0_28, %c0_29, %c0_30] : memref<2x8x128xf32, #tpu.memory_space<vmem>>, vector<2x8x128xf32>
    tpu.vector_store %arg7[%c0_28, %c0_29, %c0_30], %69 {strides = array<i32>} : memref<2x8x128xf32, #tpu.memory_space<vmem>>, vector<2x8x128xf32>,
    return
  }
  func.func @transform_0(%arg0: i32) -> (i32, i32, i32) {
    %c0_i32 = arith.constant 0 : i32
    %c0_i32_0 = arith.constant 0 : i32
    %c0_i32_1 = arith.constant 0 : i32
    return %arg0, %c0_i32, %c0_i32_0 : i32, i32, i32
  }
  func.func @transform_1(%arg0: i32) -> (i32, i32) {
    %c0_i32 = arith.constant 0 : i32
    %c0_i32_0 = arith.constant 0 : i32
    %c0_i32_1 = arith.constant 0 : i32
    return %c0_i32, %c0_i32_0 : i32, i32
  }
  func.func @transform_2(%arg0: i32) -> (i32, i32) {
    %c0_i32 = arith.constant 0 : i32
    %c0_i32_0 = arith.constant 0 : i32
    %c0_i32_1 = arith.constant 0 : i32
    return %c0_i32, %c0_i32_0 : i32, i32
  }
  func.func @transform_3(%arg0: i32) -> (i32, i32) {
    %c0_i32 = arith.constant 0 : i32
    %c0_i32_0 = arith.constant 0 : i32
    %c0_i32_1 = arith.constant 0 : i32
    return %c0_i32, %c0_i32_0 : i32, i32
  }
  func.func @transform_4(%arg0: i32) -> (i32, i32) {
    %c0_i32 = arith.constant 0 : i32
    %c0_i32_0 = arith.constant 0 : i32
    %c0_i32_1 = arith.constant 0 : i32
    return %c0_i32, %c0_i32_0 : i32, i32
  }
  func.func @transform_5(%arg0: i32) -> (i32, i32) {
    %c0_i32 = arith.constant 0 : i32
    %c0_i32_0 = arith.constant 0 : i32
    %c0_i32_1 = arith.constant 0 : i32
    return %c0_i32, %c0_i32_0 : i32, i32
  }
  func.func @transform_6(%arg0: i32) -> (i32, i32, i32) {
    %c0_i32 = arith.constant 0 : i32
    %c0_i32_0 = arith.constant 0 : i32
    %c0_i32_1 = arith.constant 0 : i32
    return %arg0, %c0_i32, %c0_i32_0 : i32, i32, i32
  }
}

</mosaic_0001>

<bundles_post_ra>
// kernel: tpu_custom_call.1
= control target key start
LH: loop header
LB: loop body
LE: loop exit
PB: predicated region body
PF: predicated region fallthrough
CT: control target
= control target key end

     0   :  { %11 = vsyncpa [#allocation3], 0  ;;  %s2042_s0 = inlined_call_operand.vmem [shape: f32[2,16,32], index: 0, kind: input, shape index: {}]   ;;  %s2043_s1 = inlined_call_operand.vmem [shape: f32[32,32], index: 1, kind: input, shape index: {}]   ;;  %s2044_s2 = inlined_call_operand.hbm [shape: f32[4,32], index: 2, kind: input, shape index: {}]   ;;  %s2045_s3 = inlined_call_operand.vmem [shape: f32[64,32], index: 3, kind: input, shape index: {}]   ;;  %s2046_s4 = inlined_call_operand.vmem [shape: f32[32,128], index: 4, kind: input, shape index: {}]   ;;  %s2047_s5 = inlined_call_operand.vmem [shape: f32[8,128], index: 5, kind: input, shape index: {}]   ;;  %s2048_s6 = inlined_call_operand.hbm [shape: f32[2,8,128], index: 6, kind: output, shape index: {}]  }
   0x1   :  { %12 = vsyncpa [#allocation4], 0  ;;  %s1792_s21 = smov [#allocation2]   ;;  %s1744_s25 = scalar_lea.hbm %s2044_s2, 64 }
   0x2   :  { %s23_s22 = sshll.u32 %s1792_s21, 4  ;;  %p1745_p0 = scmp.ne.s32.totalorder %s2044_s2, %s1744_s25  ;;  %s24_s22 = int_to_ptr.vmem [resolvable:$true] %s23_s22 }
   0x3   :  { %p1748_p1 = scmp.lt.u32.totalorder %s1744_s25, %s2044_s2 }
   0x5   :  { %p1750_p2 = pnand %p1748_p1, %p1745_p0 }
   0x7   :  { %1753 = shalt.err (!%p1750_p2)
}
   0x8   :  { %s1754_s30 = scalar_lea.vmem %s24_s22, 64  ;;  %p1759_p4 = scmp.lt.s32.totalorder %s24_s22, %s24_s22 }
   0x9   :  { %p1755_p3 = scmp.ne.s32.totalorder %s24_s22, %s1754_s30  ;;  %p1760_p5 = scmp.lt.s32.totalorder %s1754_s30, %s1754_s30 }
   0xb   :  { %p1761_p6 = por %p1760_p5, %p1759_p4 }
   0xd   :  { %p1762_p7 = pnand %p1761_p6, %p1755_p3 }
   0xf   :  { %1765 = shalt.err (!%p1762_p7)
}
  0x10   :  { %26 = dma.hbm_to_vmem [thread:$0]  %s2044_s2, 64, %s24_s22, [#allocation3]  }
  0x11   :  { %1788 = dma.done.wait [#allocation3], 64  }
  0x12   :  { %1789 = vsyncadd [#allocation3], 4294967232  ;;  %v1793_v0 = vmov 0.0|0.0   ;;  %vm1794_vm0 = vmmov 0   ;;  %v1795_v1 = vmov 0.0   ;;  %vm49_vm1 = vcmask 261120  }
  0x13   :  { %1655 = vmatprep.subr.bf16.mxu0 %v1793_v0  ;;  %1543 = vmatprep.mubr.msk.f32.mxu0 %vm1794_vm0, %v1795_v1  ;;  %v71_v2 = vld [vmem:[%s2043_s1] sm:$0xff]  ;;  %v72_v3 = vld [vmem:[%s2043_s1 + $0x8] sm:$0xff]  ;;  %v73_v4 = vld [vmem:[%s2043_s1 + $0x10] sm:$0xff]  ;;  %vm77_vm2 = vcmask 1041409   ;;  %v1796_v34 = vmov 1966171168   ;;  %v156_v36 = vlaneseq }
  0x14   :  { %v1656_v5 = vpack.c.bf16 %v72_v3, %v71_v2  ;;  %v74_v6 = vld [vmem:[%s2043_s1 + $0x18] sm:$0xff]  ;;  %v1866_v7 = vld [vmem:[%s2042_s0] sm:$0xff]  ;;  %v1871_v8 = vld [vmem:[%s2042_s0 + $0x8] sm:$0xff]  ;;  %v154_v35 = vunpack.c.l.s4 %v1796_v34  ;;  %vm233_vm3 = vcmask 130048   ;;  %vm562_vm4 = vcmask 1043456   ;;  %s1798_s21 = smov [#allocation5]  }
  0x15   :  { %v1876_v9 = vld [vmem:[%s2042_s0 + $0x10] sm:$0xff]  ;;  %v1881_v10 = vld [vmem:[%s2042_s0 + $0x18] sm:$0xff]  ;;  %v50_v11 = vsel %vm49_vm1, %v1866_v7, 0.0  ;;  %v51_v12 = vsel %vm49_vm1, %v1871_v8, 0.0  ;;  %v1659_v13 = vpack.c.bf16 %v74_v6, %v73_v4  ;;  %v1893_v39 = vshrl.u32 %v156_v36, 7  ;;  %s1423_s22 = sshll.u32 %s1798_s21, 4  ;;  %s1424_s22 = int_to_ptr.vmem [resolvable:$true] %s1423_s22 }
  0x16   :  { %1657 = vmatpush3.bf16.msra.mxu0 %v1656_v5  ;;  %v52_v14 = vadd.f32 %v51_v12, %v50_v11  ;;  %v59_v15 = vsel %vm49_vm1, %v1876_v9, 0.0  ;;  %v60_v16 = vsel %vm49_vm1, %v1881_v10, 0.0  ;;  %v155_v38 = vunpack.c.0.s8 %v154_v35  ;;  %p1771_p9 = scmp.lt.s32.totalorder %s1424_s22, %s1424_s22 }
  0x17   :  { %1658 = vmatprep.subr.bf16.mxu0 %v1793_v0  ;;  %v61_v17 = vadd.f32 %v60_v16, %v59_v15  ;;  %v1897_v43 = vsub.s32 0, %v1893_v39  ;;  %v532_v16 = vld [vmem:[#allocation2] sm:$0xf]  ;;  %vm537_vm5 = vcmask 31744  }
  0x18   :  { %v53_v18 = vrot.slane %v52_v14, 4  ;;  %v158_v40 = vsub.s32 %v155_v38, %v1893_v39 }
  0x19   :  { %v62_v19 = vrot.slane %v61_v17, 4 }
  0x1a   :  { %1660 = vmatpush3.bf16.msra.mxu0 %v1659_v13  ;;  %v54_v20 = vadd.f32 %v53_v18, %v52_v14  ;;  %v1797_v13 = vmov 0  }
  0x1b   :  { %v63_v21 = vadd.f32 %v62_v19, %v61_v17 }
  0x1c   :  { %v55_v22 = vrot.slane %v54_v20, 2 }
  0x1d   :  { %v64_v23 = vrot.slane %v63_v21, 2 }
  0x1e   :  { %v56_v24 = vadd.f32 %v55_v22, %v54_v20 }
  0x1f   :  { %v65_v25 = vadd.f32 %v64_v23, %v63_v21  ;;  %v841_v23 = vmul.f32 %v1866_v7, %v1866_v7 }
  0x20   :  { %v57_v26 = vrot.slane %v56_v24, 1 }
  0x21   :  { %v66_v27 = vrot.slane %v65_v25, 1 }
  0x22   :  { %v58_v28 = vadd.f32 %v57_v26, %v56_v24  ;;  %v845_v24 = vsel %vm49_vm1, %v841_v23, 0.0 }
  0x23   :  { %v67_v29 = vadd.f32 %v66_v27, %v65_v25  ;;  %v843_v25 = vmul.f32 %v1876_v9, %v1876_v9  ;;  %v844_v27 = vmul.f32 %v1881_v10, %v1881_v10 }
  0x24   :  { %v69_v30 = vmul.f32 0.0625, %v58_v28  ;;  %v842_v28 = vmul.f32 %v1871_v8, %v1871_v8 }
  0x25   :  { %v70_v31 = vmul.f32 0.0625, %v67_v29  ;;  %v851_v26 = vsel %vm49_vm1, %v843_v25, 0.0  ;;  %v854_v29 = vsel %vm49_vm1, %v844_v27, 0.0 }
  0x27   :  { %v78_v32 = vsel %vm77_vm2, %v70_v31, %v69_v30  ;;  %v848_v30 = vsel %vm49_vm1, %v842_v28, 0.0  ;;  %v1938_v31 = vld [vmem:[%s2047_s5] sm:$0xff] }
  0x28   :  { %1544 = vmatmul.mubr.msk.f32.vlgmr.msra.gmra.mrb[0].mxu0 %vm49_vm1, %v78_v32  ;;  %v514_v32 = vsub.s32 1, %v1893_v39 }
  0x2a   :  { %v515_v34 = vrot.slane %v1938_v31, %v514_v32 }
  0xfb   :  { %v147_v33 = vpop.f32.mrb[0].mxu0 }
  0xfc   :  { %1726 = vtanh.f32 %v147_v33  ;;  %v1545_v37 = vpop.f32.mrb[1].mxu0  ;;  %v503_v33 = vrot.slane %v1938_v31, %v1897_v43 }
 0x106   :  { %v1727_v41 = vpop.eup %1726 }
 0x107   :  { %v159_v42 = vrot.slane %v1727_v41, %v158_v40 }
 0x109   :  { %v167_v44 = vrot.slane %v159_v42, %v158_v40  ;;  %v160_v45 = vcombine.high %v159_v42, %v159_v42 }
 0x10b   :  { %v178_v46 = vrot.slane %v167_v44, %v1897_v43  ;;  %v174_v47 = vrot.slane %v160_v45, %v158_v40 }
 0x10d   :  { %v185_v48 = vmul.f32 %v178_v46, %v1866_v7  ;;  %v182_v49 = vrot.slane %v174_v47, %v1897_v43  ;;  %v186_v52 = vmul.f32 %v178_v46, %v1871_v8 }
 0x10f   :  { %v189_v50 = vsel %vm49_vm1, %v185_v48, 0.0  ;;  %v187_v51 = vmul.f32 %v182_v49, %v1876_v9  ;;  %v188_v54 = vmul.f32 %v182_v49, %v1881_v10  ;;  %v192_v55 = vsel %vm49_vm1, %v186_v52, 0.0 }
 0x110   :  { %190 = vadd.xlane.f32.xlu0 %v189_v50 }
 0x111   :  { %v195_v53 = vsel %vm49_vm1, %v187_v51, 0.0  ;;  %v198_v56 = vsel %vm49_vm1, %v188_v54, 0.0 }
 0x112   :  { %196 = vadd.xlane.f32.xlu1 %v195_v53 }
 0x114   :  { %193 = vadd.xlane.f32.xlu0 %v192_v55 }
 0x116   :  { %199 = vadd.xlane.f32.xlu1 %v198_v56 }
 0x141   :  { %201 = vxpose.xlu0.b32.start [1/2] (short) (narrow) %v1866_v7, 32 }
 0x145   :  { %202 = vxpose.xlu0.b32.end [2/2] (short) (narrow) %v1871_v8, 32 }
 0x149   :  { %331 = vxpose.xlu1.b32.start [1/2] (short) (narrow) %v1876_v9, 32 }
 0x14d   :  { %332 = vxpose.xlu1.b32.end [2/2] (short) (narrow) %v1881_v10, 32 }
 0x16b   :  { %1725 = vset.pattern.permute.xlu1 %v1797_v13 }
 0x16e   :  { %1724 = vset.pattern.permute.xlu0 %v1797_v13  ;;  %v535_v13 = vsub.s32 2, %v1893_v39 }
 0x19d   :  { %v191_v57 = vpop.xlane.xlu0 %190 }
 0x19f   :  { %v197_v58 = vpop.xlane.xlu1 %196 }
 0x1a1   :  { %v194_v59 = vpop.xlane.xlu0 %193 }
 0x1a2   :  { %v1661_v60 = vpack.c.bf16 %v194_v59, %v191_v57 }
 0x1a3   :  { %v200_v61 = vpop.xlane.xlu1 %199 }
 0x1a4   :  { %v1665_v62 = vpack.c.bf16 %v200_v61, %v197_v58  ;;  %1662 = vmatprep.subr.bf16.mxu1 %v1661_v60 }
 0x1a5   :  { %1664 = vmatpush3.bf16.msra.mxu1 %v1661_v60 }
 0x1a6   :  { %1666 = vmatprep.subr.bf16.mxu0 %v1665_v62  ;;  %1566 = vmatprep.subr.msk.mxu1 %vm562_vm4, %v532_v16 }
 0x1a7   :  { %1668 = vmatpush3.bf16.msra.mxu0 %v1665_v62 }
 0x1c1   :  { %v217_v63 = vpop.trf.xlu0 }
 0x1c2   :  { %1550 = vmatprep.mubr.msk.f32.mxu1 %vm233_vm3, %v217_v63 }
 0x1c5   :  { %v218_v2 = vpop.trf.xlu0 }
 0x1c6   :  { %1551 = vmatmul.mubr.msk.f32.vlgmr.msra.gmra.mrb[0].mxu1 %vm233_vm3, %v218_v2 }
 0x1c7   :  { %1567 = vmatpush3.msk.msra.mxu1 %vm562_vm4, %v532_v16 }
 0x1c9   :  { %v219_v3 = vpop.trf.xlu0  ;;  %v347_v4 = vpop.trf.xlu1 }
 0x1ca   :  { %1553 = vmatprep.mubr.msk.f32.mxu1 %vm233_vm3, %v219_v3  ;;  %1560 = vmatprep.mubr.msk.f32.mxu0 %vm233_vm3, %v347_v4 }
 0x1cd   :  { %v220_v5 = vpop.trf.xlu0  ;;  %v348_v6 = vpop.trf.xlu1 }
 0x1ce   :  { %1554 = vmatmul.mubr.msk.f32.gmra.mrb[2].mxu1 %vm233_vm3, %v220_v5  ;;  %1561 = vmatmul.mubr.msk.f32.vlgmr.msra.gmra.mrb[2].mxu0 %vm233_vm3, %v348_v6  ;;  %v41_v6 = vld [vmem:[%s2045_s3] sm:$0xff] }
 0x1d1   :  { %v349_v11 = vpop.trf.xlu1 }
 0x1d2   :  { %1563 = vmatprep.mubr.msk.f32.mxu0 %vm233_vm3, %v349_v11  ;;  %v42_v11 = vld [vmem:[%s2045_s3 + $0x8] sm:$0xff] }
 0x1d5   :  { %v350_v12 = vpop.trf.xlu1 }
 0x1d6   :  { %1564 = vmatmul.mubr.msk.f32.gmra.mrb[4].mxu0 %vm233_vm3, %v350_v12  ;;  %v1685_v12 = vpack.c.bf16 %v42_v11, %v41_v6  ;;  %v44_v6 = vld [vmem:[%s2045_s3 + $0x18] sm:$0xff] }
 0x1d7   :  { %1588 = vmatprep.mubr.msk.f32.mxu0 %vm49_vm1, %v1866_v7 }
 0x1d8   :  { %1686 = vmatprep.subr.bf16.mxu1 %v1685_v12 }
 0x299   :  { %v1552_v14 = vpop.f32.mrb[0].mxu1 }
 0x29a   :  { %v312_v15 = vpop.f32.mrb[1].mxu1  ;;  %467 = vperm.xlu1 %1725, %v1552_v14   ;;  %v536_v14 = vrot.slane %v1938_v31, %v535_v13 }
 0x29b   :  { %462 = vperm.xlu0 %1724, %v312_v15  }
 0x2a1   :  { %v1555_v17 = vpop.f32.mrb[2].mxu1  ;;  %v1562_v18 = vpop.f32.mrb[2].mxu0 }
 0x2a2   :  { %v322_v19 = vpop.f32.mrb[3].mxu1  ;;  %v441_v20 = vpop.f32.mrb[3].mxu0 }
 0x2a3   :  { %472 = vperm.xlu1 %1725, %v322_v19   ;;  %482 = vperm.xlu0 %1724, %v441_v20  }
 0x2a7   :  { %477 = vperm.xlu1 %1725, %v1555_v17  }
 0x2a9   :  { %v1565_v21 = vpop.f32.mrb[4].mxu0 }
 0x2aa   :  { %v451_v22 = vpop.f32.mrb[5].mxu0 }
 0x2ab   :  { %487 = vperm.xlu1 %1725, %v1562_v18   ;;  %492 = vperm.xlu0 %1724, %v451_v22  }
 0x2af   :  { %497 = vperm.xlu1 %1725, %v1565_v21  }
 0x2ca   :  { %846 = vadd.xlane.f32.xlu0 %v845_v24 }
 0x2ce   :  { %852 = vadd.xlane.f32.xlu0 %v851_v26 }
 0x2d2   :  { %855 = vadd.xlane.f32.xlu0 %v854_v29 }
 0x2d3   :  { %849 = vadd.xlane.f32.xlu1 %v848_v30 }
 0x319   :  { %v468_v35 = vpop.permute.xlu1 %467 }
 0x31a   :  { %v505_v36 = vmul.f32 %v503_v33, %v468_v35  ;;  %v463_v37 = vpop.permute.xlu0 %462 }
 0x31b   :  { %v504_v38 = vmul.f32 %v503_v33, %v463_v37 }
 0x31c   :  { %v517_v40 = vadd.f32 %v515_v34, %v505_v36 }
 0x31d   :  { %v516_v41 = vadd.f32 %v515_v34, %v504_v38 }
 0x31e   :  { %v525_v44 = vmax.f32 %v517_v40, 0.0 }
 0x31f   :  { %v524_v42 = vmax.f32 %v516_v41, 0.0 }
 0x321   :  { %1568 = vmatprep.mubr.msk.f32.mxu1 %vm537_vm5, %v524_v42 }
 0x322   :  { %1569 = vmatmul.mubr.msk.f32.vlgmr.msra.gmra.mrb[4].mxu1 %vm537_vm5, %v525_v44  ;;  %v473_v45 = vpop.permute.xlu1 %472  ;;  %v483_v46 = vpop.permute.xlu0 %482 }
 0x323   :  { %v506_v47 = vmul.f32 %v503_v33, %v473_v45  ;;  %v508_v48 = vmul.f32 %v503_v33, %v483_v46  ;;  %1688 = vmatpush3.bf16.msra.mxu1 %v1685_v12 }
 0x325   :  { %v518_v43 = vadd.f32 %v515_v34, %v506_v47  ;;  %v520_v52 = vadd.f32 %v515_v34, %v508_v48 }
 0x326   :  { %v478_v49 = vpop.permute.xlu1 %477 }
 0x327   :  { %v526_v50 = vmax.f32 %v518_v43, 0.0  ;;  %v507_v51 = vmul.f32 %v503_v33, %v478_v49  ;;  %v528_v59 = vmax.f32 %v520_v52, 0.0 }
 0x329   :  { %v519_v53 = vadd.f32 %v515_v34, %v507_v51  ;;  %1571 = vmatprep.mubr.msk.f32.mxu1 %vm537_vm5, %v526_v50 }
 0x32a   :  { %v488_v54 = vpop.permute.xlu1 %487  ;;  %v493_v55 = vpop.permute.xlu0 %492 }
 0x32b   :  { %v527_v56 = vmax.f32 %v519_v53, 0.0  ;;  %v509_v57 = vmul.f32 %v503_v33, %v488_v54  ;;  %v510_v58 = vmul.f32 %v503_v33, %v493_v55 }
 0x32d   :  { %v521_v60 = vadd.f32 %v515_v34, %v509_v57  ;;  %v522_v61 = vadd.f32 %v515_v34, %v510_v58  ;;  %1572 = vmatmul.mubr.msk.f32.gmra.mrb[6].mxu1 %vm537_vm5, %v527_v56 }
 0x32e   :  { %1574 = vmatprep.mubr.msk.f32.mxu1 %vm537_vm5, %v528_v59  ;;  %v498_v62 = vpop.permute.xlu1 %497 }
 0x32f   :  { %v529_v63 = vmax.f32 %v521_v60, 0.0  ;;  %v530_v2 = vmax.f32 %v522_v61, 0.0  ;;  %v511_v3 = vmul.f32 %v503_v33, %v498_v62 }
 0x331   :  { %v523_v4 = vadd.f32 %v515_v34, %v511_v3  ;;  %1575 = vmatmul.mubr.msk.f32.gmra.mrb[8].mxu1 %vm537_vm5, %v529_v63 }
 0x332   :  { %1577 = vmatprep.mubr.msk.f32.mxu1 %vm537_vm5, %v530_v2 }
 0x333   :  { %v531_v5 = vmax.f32 %v523_v4, 0.0 }
 0x335   :  { %1578 = vmatmul.mubr.msk.f32.gmra.mrb[10].mxu1 %vm537_vm5, %v531_v5  ;;  %v43_v5 = vld [vmem:[%s2045_s3 + $0x10] sm:$0xff] }
 0x336   :  { %v1689_v11 = vpack.c.bf16 %v44_v6, %v43_v5 }
 0x338   :  { %1690 = vmatprep.subr.bf16.mxu1 %v1689_v11 }
 0x339   :  { %1692 = vmatpush3.bf16.msra.mxu1 %v1689_v11 }
 0x33a   :  { %1701 = vmatprep.subr.bf16.mxu1 %v1793_v0 }
 0x3f5   :  { %v1570_v15 = vpop.f32.mrb[4].mxu1 }
 0x3f6   :  { %v638_v16 = vadd.f32 %v1570_v15, %v536_v14  ;;  %v632_v17 = vpop.f32.mrb[5].mxu1 }
 0x3f7   :  { %v633_v18 = vadd.f32 %v632_v17, %v536_v14 }
 0x3f8   :  { %v672_v19 = vmax.f32 %v638_v16, 0.0 }
 0x3f9   :  { %v671_v20 = vmax.f32 %v633_v18, 0.0 }
 0x3fa   :  { %v858_v21 = vmul.f32 %v672_v19, %v672_v19 }
 0x3fb   :  { %v1669_v22 = vpack.c.bf16 %v672_v19, %v671_v20  ;;  %v857_v23 = vmul.f32 %v671_v20, %v671_v20  ;;  %v847_v20 = vpop.xlane.xlu0 %846 }
 0x3fc   :  { %v866_v24 = vsel %vm49_vm1, %v858_v21, 0.0 }
 0x3fd   :  { %v865_v25 = vsel %vm49_vm1, %v857_v23, 0.0  ;;  %1670 = vmatprep.subr.bf16.mxu0 %v1669_v22  ;;  %v850_v23 = vpop.xlane.xlu1 %849 }
 0x3fe   :  { %v867_v26 = vadd.f32 %v866_v24, %v865_v25  ;;  %1672 = vmatpush3.bf16.msra.mxu0 %v1669_v22 }
 0x3ff   :  { %v853_v24 = vpop.xlane.xlu0 %852 }
 0x400   :  { %v1573_v27 = vpop.f32.mrb[6].mxu1 }
 0x401   :  { %v648_v28 = vadd.f32 %v1573_v27, %v536_v14  ;;  %v642_v29 = vpop.f32.mrb[7].mxu1 }
 0x402   :  { %v643_v30 = vadd.f32 %v642_v29, %v536_v14 }
 0x403   :  { %v674_v32 = vmax.f32 %v648_v28, 0.0 }
 0x404   :  { %v673_v33 = vmax.f32 %v643_v30, 0.0  ;;  %v1576_v34 = vpop.f32.mrb[8].mxu1 }
 0x405   :  { %v658_v35 = vadd.f32 %v1576_v34, %v536_v14  ;;  %v652_v36 = vpop.f32.mrb[9].mxu1  ;;  %v860_v37 = vmul.f32 %v674_v32, %v674_v32 }
 0x406   :  { %v1673_v38 = vpack.c.bf16 %v674_v32, %v673_v33  ;;  %v859_v40 = vmul.f32 %v673_v33, %v673_v33  ;;  %v653_v41 = vadd.f32 %v652_v36, %v536_v14  ;;  %v856_v32 = vpop.xlane.xlu0 %855 }
 0x407   :  { %v676_v42 = vmax.f32 %v658_v35, 0.0  ;;  %v870_v50 = vsel %vm49_vm1, %v860_v37, 0.0 }
 0x408   :  { %v868_v44 = vsel %vm49_vm1, %v859_v40, 0.0  ;;  %v675_v45 = vmax.f32 %v653_v41, 0.0  ;;  %v1579_v46 = vpop.f32.mrb[10].mxu1  ;;  %1674 = vmatprep.subr.bf16.mxu0 %v1673_v38 }
 0x409   :  { %v869_v47 = vadd.f32 %v868_v44, %v867_v26  ;;  %v862_v48 = vmul.f32 %v676_v42, %v676_v42  ;;  %v668_v43 = vadd.f32 %v1579_v46, %v536_v14  ;;  %v662_v49 = vpop.f32.mrb[11].mxu1  ;;  %1676 = vmatpush3.bf16.msra.mxu0 %v1673_v38 }
 0x40a   :  { %v1677_v51 = vpack.c.bf16 %v676_v42, %v675_v45  ;;  %v861_v52 = vmul.f32 %v675_v45, %v675_v45  ;;  %v663_v53 = vadd.f32 %v662_v49, %v536_v14 }
 0x40b   :  { %v871_v54 = vadd.f32 %v870_v50, %v869_v47  ;;  %v879_v55 = vsel %vm49_vm1, %v862_v48, 0.0  ;;  %v678_v56 = vmax.f32 %v668_v43, 0.0  ;;  %v45_v50 = vld [vmem:[%s2045_s3 + $0x20] sm:$0xff] }
 0x40c   :  { %v878_v57 = vsel %vm49_vm1, %v861_v52, 0.0  ;;  %v677_v58 = vmax.f32 %v663_v53, 0.0  ;;  %1589 = vmatmul.mubr.msk.f32.vlgmr.msra.gmra.mrb[6].mxu0 %vm49_vm1, %v1871_v8  ;;  %1678 = vmatprep.subr.bf16.mxu0 %v1677_v51  ;;  %v47_v53 = vld [vmem:[%s2045_s3 + $0x30] sm:$0xff] }
 0x40d   :  { %v880_v59 = vadd.f32 %v879_v55, %v878_v57  ;;  %1680 = vmatpush3.bf16.msra.mxu0 %v1677_v51  ;;  %1599 = vmatprep.mubr.msk.f32.mxu0 %vm49_vm1, %v1876_v9  ;;  %v864_v60 = vmul.f32 %v678_v56, %v678_v56  ;;  %v872_v12 = vrot.slane %v871_v54, 4  ;;  %v46_v51 = vld [vmem:[%s2045_s3 + $0x28] sm:$0xff] }
 0x40e   :  { %v1681_v61 = vpack.c.bf16 %v678_v56, %v677_v58  ;;  %v863_v62 = vmul.f32 %v677_v58, %v677_v58  ;;  %v1693_v52 = vpack.c.bf16 %v46_v51, %v45_v50 }
 0x40f   :  { %v883_v3 = vsel %vm49_vm1, %v864_v60, 0.0  ;;  %v873_v13 = vadd.f32 %v872_v12, %v871_v54  ;;  %v48_v54 = vld [vmem:[%s2045_s3 + $0x38] sm:$0xff] }
 0x410   :  { %v881_v63 = vsel %vm49_vm1, %v863_v62, 0.0  ;;  %1682 = vmatprep.subr.bf16.mxu0 %v1681_v61  ;;  %v1697_v55 = vpack.c.bf16 %v48_v54, %v47_v53 }
 0x411   :  { %v882_v2 = vadd.f32 %v881_v63, %v880_v59  ;;  %1684 = vmatpush3.bf16.msra.mxu0 %v1681_v61  ;;  %v874_v14 = vrot.slane %v873_v13, 2 }
 0x412   :  { %1694 = vmatprep.subr.bf16.mxu0 %v1693_v52 }
 0x413   :  { %v884_v4 = vadd.f32 %v883_v3, %v882_v2  ;;  %v875_v16 = vadd.f32 %v874_v14, %v873_v13  ;;  %v1702_v14 = vpack.c.bf16 %v1871_v8, %v1866_v7  ;;  %v1327_v7 = vld [vmem:[%s2046_s4] sm:$0xff] }
 0x414   :  { %1600 = vmatmul.mubr.msk.f32.vlgmr.msra.gmra.mrb[8].mxu0 %vm49_vm1, %v1881_v10 }
 0x415   :  { %v885_v15 = vrot.slane %v884_v4, 4  ;;  %v876_v18 = vrot.slane %v875_v16, 1  ;;  %1696 = vmatpush3.bf16.msra.mxu0 %v1693_v52 }
 0x416   :  { %1698 = vmatprep.subr.bf16.mxu0 %v1697_v55 }
 0x417   :  { %v886_v17 = vadd.f32 %v885_v15, %v884_v4  ;;  %v877_v21 = vadd.f32 %v876_v18, %v875_v16  ;;  %v1111_v15 = vsub.s32 3, %v1893_v39 }
 0x419   :  { %v887_v19 = vrot.slane %v886_v17, 2  ;;  %v892_v25 = vmul.f32 %v877_v21, %v850_v23  ;;  %v891_v27 = vmul.f32 %v877_v21, %v847_v20  ;;  %1700 = vmatpush3.bf16.msra.mxu0 %v1697_v55  ;;  %v1112_v16 = vrot.slane %v1938_v31, %v1111_v15 }
 0x41b   :  { %v888_v22 = vadd.f32 %v887_v19, %v886_v17  ;;  %v896_v28 = vmax.f32 %v892_v25, 1e-12  ;;  %v895_v30 = vmax.f32 %v891_v27, 1e-12  ;;  %v1705_v25 = vpack.c.bf16 %v1881_v10, %v1876_v9 }
 0x41d   :  { %v889_v26 = vrot.slane %v888_v22, 1  ;;  %1728 = vrsqrt.f32 %v896_v28  ;;  %v1329_v28 = vld [vmem:[%s2046_s4 + $0x10] sm:$0xff] }
 0x41e   :  { %1730 = vrsqrt.f32 %v895_v30 }
 0x41f   :  { %v890_v29 = vadd.f32 %v889_v26, %v888_v22 }
 0x421   :  { %v894_v33 = vmul.f32 %v890_v29, %v856_v32  ;;  %v893_v34 = vmul.f32 %v890_v29, %v853_v24  ;;  %v1330_v29 = vld [vmem:[%s2046_s4 + $0x18] sm:$0xff] }
 0x422   :  { %v1711_v30 = vpack.c.bf16 %v1330_v29, %v1329_v28 }
 0x423   :  { %v898_v35 = vmax.f32 %v894_v33, 1e-12  ;;  %v897_v36 = vmax.f32 %v893_v34, 1e-12  ;;  %v1333_v33 = vsub.s32 4, %v1893_v39 }
 0x425   :  { %1732 = vrsqrt.f32 %v898_v35  ;;  %v1334_v34 = vrot.slane %v1938_v31, %v1333_v33 }
 0x426   :  { %1734 = vrsqrt.f32 %v897_v36 }
 0x427   :  { %v1729_v37 = vpop.eup %1728 }
 0x428   :  { %v1731_v40 = vpop.eup %1730 }
 0x42f   :  { %v1733_v45 = vpop.eup %1732 }
 0x430   :  { %v1735_v47 = vpop.eup %1734 }
 0x4df   :  { %v1590_v38 = vpop.f32.mrb[6].mxu0 }
 0x4e0   :  { %v904_v41 = vmul.f32 %v1729_v37, %v1590_v38  ;;  %v751_v42 = vpop.f32.mrb[7].mxu0 }
 0x4e1   :  { %v903_v44 = vmul.f32 %v1731_v40, %v751_v42 }
 0x4e3   :  { %1610 = vmatprep.mubr.msk.f32.mxu1 %vm49_vm1, %v903_v44 }
 0x4e4   :  { %1611 = vmatmul.mubr.msk.f32.vlgmr.msra.gmra.mrb[12].mxu1 %vm49_vm1, %v904_v41 }
 0x4e5   :  { %1703 = vmatpush3.bf16.msra.mxu1 %v1702_v14 }
 0x4e6   :  { %1704 = vmatprep.subr.bf16.mxu1 %v1793_v0  ;;  %v1328_v0 = vld [vmem:[%s2046_s4 + $0x8] sm:$0xff]  ;;  %s1766_s4 = scalar_lea.vmem %s1424_s22, 256 }
 0x4e7   :  { %v1601_v46 = vpop.f32.mrb[8].mxu0  ;;  %v1707_v24 = vpack.c.bf16 %v1328_v0, %v1327_v7  ;;  %p1767_p8 = scmp.ne.s32.totalorder %s1424_s22, %s1766_s4  ;;  %p1772_p10 = scmp.lt.s32.totalorder %s1766_s4, %s1766_s4 }
 0x4e8   :  { %v906_v48 = vmul.f32 %v1733_v45, %v1601_v46  ;;  %v832_v43 = vpop.f32.mrb[9].mxu0 }
 0x4e9   :  { %v905_v49 = vmul.f32 %v1735_v47, %v832_v43  ;;  %1708 = vmatprep.subr.bf16.mxu0 %v1707_v24  ;;  %p1773_p11 = por %p1772_p10, %p1771_p9 }
 0x4eb   :  { %1613 = vmatprep.mubr.msk.f32.mxu1 %vm49_vm1, %v905_v49  ;;  %p1774_p12 = pnand %p1773_p11, %p1767_p8 }
 0x4ec   :  { %1614 = vmatmul.mubr.msk.f32.gmra.mrb[14].mxu1 %vm49_vm1, %v906_v48 }
 0x4ed   :  { %1634 = vmatprep.mubr.msk.f32.mxu1 %vm1794_vm0, %v1795_v1 }
 0x5b7   :  { %v1612_v56 = vpop.f32.mrb[12].mxu1 }
 0x5b8   :  { %v991_v57 = vadd.f32 1e-10, %v1612_v56  ;;  %v985_v58 = vpop.f32.mrb[13].mxu1 }
 0x5b9   :  { %v986_v59 = vadd.f32 1e-10, %v985_v58 }
 0x5ba   :  { %1736 = vrcp.f32 %v991_v57 }
 0x5bb   :  { %1738 = vrcp.f32 %v986_v59 }
 0x5bf   :  { %v1615_v60 = vpop.f32.mrb[14].mxu1 }
 0x5c0   :  { %v1001_v61 = vadd.f32 1e-10, %v1615_v60  ;;  %v995_v62 = vpop.f32.mrb[15].mxu1 }
 0x5c1   :  { %v996_v63 = vadd.f32 1e-10, %v995_v62 }
 0x5c2   :  { %1740 = vrcp.f32 %v1001_v61 }
 0x5c3   :  { %1742 = vrcp.f32 %v996_v63 }
 0x5c4   :  { %v1737_v2 = vpop.eup %1736 }
 0x5c5   :  { %v1739_v3 = vpop.eup %1738  ;;  %v1007_v5 = vmul.f32 %v1737_v2, %v904_v41 }
 0x5c6   :  { %v1005_v4 = vmul.f32 %v1739_v3, %v903_v44 }
 0x5c8   :  { %1624 = vmatprep.mubr.msk.f32.mxu0 %vm49_vm1, %v1005_v4 }
 0x5c9   :  { %1625 = vmatmul.mubr.msk.f32.vlgmr.msra.gmra.mrb[10].mxu0 %vm49_vm1, %v1007_v5 }
 0x5ca   :  { %1710 = vmatpush3.bf16.msra.mxu0 %v1707_v24 }
 0x5cb   :  { %1712 = vmatprep.subr.bf16.mxu0 %v1711_v30 }
 0x5cc   :  { %v1741_v6 = vpop.eup %1740 }
 0x5cd   :  { %v1743_v11 = vpop.eup %1742  ;;  %v1011_v13 = vmul.f32 %v1741_v6, %v906_v48 }
 0x5ce   :  { %v1009_v12 = vmul.f32 %v1743_v11, %v905_v49  ;;  %1714 = vmatpush3.bf16.msra.mxu0 %v1711_v30 }
 0x5d0   :  { %1627 = vmatprep.mubr.msk.f32.mxu0 %vm49_vm1, %v1009_v12 }
 0x5d1   :  { %1628 = vmatmul.mubr.msk.f32.gmra.mrb[12].mxu0 %vm49_vm1, %v1011_v13 }
 0x69c   :  { %v1626_v17 = vpop.f32.mrb[10].mxu0 }
 0x69d   :  { %v1090_v18 = vpop.f32.mrb[11].mxu0  ;;  %v1114_v20 = vadd.f32 %v1626_v17, %v1112_v16 }
 0x69e   :  { %v1113_v19 = vadd.f32 %v1112_v16, %v1090_v18 }
 0x6a0   :  { %1117 = vxpose.xlu0.b32.start [1/2] (short) (narrow) %v1113_v19, 8 }
 0x6a4   :  { %1118 = vxpose.xlu0.b32.end [2/2] (short) (narrow) %v1114_v20, 8  ;;  %v1629_v21 = vpop.f32.mrb[12].mxu0 }
 0x6a5   :  { %v1100_v22 = vpop.f32.mrb[13].mxu0  ;;  %v1116_v8 = vadd.f32 %v1629_v21, %v1112_v16 }
 0x6a6   :  { %v1115_v23 = vadd.f32 %v1112_v16, %v1100_v22 }
 0x6a8   :  { %1222 = vxpose.xlu1.b32.start [1/2] (short) (narrow) %v1115_v23, 8 }
 0x6ac   :  { %1223 = vxpose.xlu1.b32.end [2/2] (short) (narrow) %v1116_v8, 8 }
 0x720   :  { %v1133_v26 = vpop.trf.xlu0 }
 0x721   :  { %1635 = vmatmul.mubr.msk.f32.vlgmr.msra.gmra.mrb[16].mxu1 %vm233_vm3, %v1133_v26 }
 0x722   :  { %1706 = vmatpush3.bf16.msra.mxu1 %v1705_v25  ;;  %1641 = vmatprep.mubr.msk.f32.mxu1 %vm1794_vm0, %v1795_v1 }
 0x728   :  { %v1238_v27 = vpop.trf.xlu1 }
 0x729   :  { %1642 = vmatmul.mubr.msk.f32.vlgmr.msra.gmra.mrb[18].mxu1 %vm233_vm3, %v1238_v27 }
 0x7f4   :  { %v1218_v9 = vpop.f32.mrb[16].mxu1 }
 0x7f5   :  { %v1636_v10 = vpop.f32.mrb[17].mxu1  ;;  %1652 = vmatprep.mubr.msk.f32.mxu0 %vm49_vm1, %v1218_v9 }
 0x7fc   :  { %v1323_v32 = vpop.f32.mrb[18].mxu1 }
 0x7fd   :  { %v1643_v1 = vpop.f32.mrb[19].mxu1  ;;  %1653 = vmatmul.mubr.msk.f32.vlgmr.msra.gmra.mrb[14].mxu0 %vm49_vm1, %v1323_v32 }
 0x8d0   :  { %v1654_v35 = vpop.f32.mrb[14].mxu0 }
 0x8d1   :  { %v1413_v36 = vadd.f32 %v1654_v35, %v1334_v34  ;;  %v1407_v37 = vpop.f32.mrb[15].mxu0 }
 0x8d2   :  { %v1408_v38 = vadd.f32 %v1407_v37, %v1334_v34 }
 0x8d3   :  { %1417 = vst [vmem:[#allocation5 + $0x8] sm:$0xff] %v1413_v36 }
 0x8d4   :  { %1416 = vst [vmem:[#allocation5] sm:$0xff] %v1408_v38 }
 0x8d5   :  { %1777 = shalt.err (!%p1774_p12)
}
 0x8d6   :  { %s1778_s1 = scalar_lea.hbm %s2048_s6, 256 }
 0x8d7   :  { %p1779_p13 = scmp.ne.s32.totalorder %s2048_s6, %s1778_s1  ;;  %p1782_p0 = scmp.lt.u32.totalorder %s1778_s1, %s2048_s6 }
 0x8d9   :  { %p1784_p1 = pnand %p1782_p0, %p1779_p13 }
 0x8db   :  { %1787 = shalt.err (!%p1784_p1)
}
 0x8dc   :  { %s1799_s27 = smov 128   ;;  %s1800_s28 = smov 8  }
 0x8dd   :  { %1429 = dma.vmem_to_hbm [thread:$0]  %s1424_s22, 256, %s2048_s6, [#allocation4], %s1799_s27, %s1799_s27, %s1800_s28  }
 0x8de   :  { %1790 = dma.done.wait [#allocation4], 256  }
 0x8df   :  { %1791 = vsyncadd [#allocation4], 4294967040 }
 0x8e0   :  { %1433 = vsyncpa [#allocation3], 1 }
 0x8e1   :  { %1434 = vsyncpa [#allocation4], 1 }

</bundles_post_ra>
